<compile_context>
chip_gen: v5e
topology: v5e:2x2
jax: 0.10.0
libtpu: 0.0.40
codegen_flags: <defaults>
</compile_context>

<pallas_src>
import functools

import jax
import jax.numpy as jnp
import numpy as np
from jax import lax
from jax.experimental import pallas as pl
from jax.experimental.pallas import tpu as pltpu


def _round_up(x, m):
    return (x + m - 1) // m * m


def _sdpa_compute(q, k, v, mask, out_ref, attn_ref, inv_temperature, mxu_dtype):
    # q: (tq, Dk), k: (Lk, Dk), v: (Lk, Dv), mask: (tq, Lk) int8 or None.
    # Fold 1/temperature into q (tq*Dk elements, far fewer than the (tq, Lk) score tile).
    q_s = (q * inv_temperature).astype(mxu_dtype)

    # scores = q @ k^T via contraction of the last dims (no XLU transpose); bf16 MXU operands,
    # f32 accumulation.
    scores = lax.dot_general(
        q_s,
        k.astype(mxu_dtype),
        dimension_numbers=(((1,), (1,)), ((), ())),
        preferred_element_type=jnp.float32,
    )

    if mask is not None:
        # Large finite negative instead of -inf: a fully-masked row becomes uniform instead of the
        # NaN the torch -inf path produces (documented divergence).
        scores = jnp.where(mask != 0, jnp.float32(-1e30), scores)

    # Softmax over the key dim (torch Softmax(dim=2)); f32 on VPU/EUP, approx reciprocal on EUP.
    smax = jnp.max(scores, axis=-1, keepdims=True)
    p = jnp.exp(scores - smax)
    denom = jnp.sum(p, axis=-1, keepdims=True)
    attn = p * pl.reciprocal(denom, approx=True)

    # TODO(synk): nn.Dropout / MC_dropout on attn (stochastic, training mode) omitted — eval mode.

    attn_ref[0] = attn.astype(attn_ref.dtype)
    out_ref[0] = jnp.dot(
        attn.astype(mxu_dtype), v.astype(mxu_dtype), preferred_element_type=jnp.float32
    ).astype(out_ref.dtype)


def _sdpa_kernel_masked(q_ref, k_ref, v_ref, mask_ref, out_ref, attn_ref, *,
                        inv_temperature, mxu_dtype):
    _sdpa_compute(q_ref[0], k_ref[0], v_ref[0], mask_ref[0], out_ref, attn_ref,
                  inv_temperature, mxu_dtype)


def _sdpa_kernel_nomask(q_ref, k_ref, v_ref, out_ref, attn_ref, *,
                        inv_temperature, mxu_dtype):
    _sdpa_compute(q_ref[0], k_ref[0], v_ref[0], None, out_ref, attn_ref,
                  inv_temperature, mxu_dtype)


def scaled_dot_product_attention(q, k, v, temperature, mask=None, *,
                                 block_q=None, mxu_dtype=jnp.bfloat16):
    """Pallas TPU ScaledDotProductAttention.forward. Returns (output, attn).

    mxu_dtype: dtype used for the MXU matmul operands (accumulation is always f32).
    Pass jnp.float32 to force exact f32 matmuls (slower on all TPU generations).
    """
    B, Lq, Dk = q.shape
    _, Lk, _ = k.shape
    _, _, Dv = v.shape

    in_b = jnp.dtype(q.dtype).itemsize
    attn_b = in_b  # attn is emitted in the input dtype

    # Per-TensorCore VMEM capacity (64 MiB on v7x, 128 MiB on v5e/v6e).
    try:
        vmem_cap = int(pltpu.get_tpu_info().vmem_capacity_bytes)
    except Exception:
        vmem_cap = 64 << 20  # conservative default (v7x)

    def footprint(bq):
        # Pallas double-buffers every BlockSpec'd operand (including the K/V blocks that are
        # revisited across q-tiles). Plus an allowance for the f32 score/prob intermediates.
        f = 2 * bq * Dk * in_b            # q tile
        f += 2 * Lk * Dk * in_b           # k tile
        f += 2 * Lk * Dv * in_b           # v tile
        if mask is not None:
            f += 2 * bq * Lk * 1          # int8 mask tile
        f += 2 * bq * Dv * in_b           # out tile
        f += 2 * bq * Lk * attn_b         # attn tile
        f += 2 * bq * Lk * 4              # f32 scores/probs intermediates
        return f

    if block_q is None:
        lq32 = _round_up(Lq, 32)
        cands = [c for c in (512, 256, 128, 64, 32) if c <= lq32] or [lq32]
        budget = int(0.60 * vmem_cap)
        fitting = [c for c in cands if footprint(c) <= budget] or [min(cands)]
        # Prefer {128,256,512}; drop to smaller tiles only when VMEM-constrained.
        preferred = [c for c in fitting if c >= 128] or fitting
        # Minimize padded-Lq waste first, then prefer the largest tile (amortizes grid overhead).
        block_q = min(preferred, key=lambda c: (_round_up(Lq, c) - Lq, -c))
    block_q = max(32, _round_up(int(block_q), 32))

    Lq_pad = _round_up(Lq, block_q)
    pad_q = Lq_pad - Lq

    q_in = jnp.pad(q, ((0, 0), (0, pad_q), (0, 0))) if pad_q else q

    inputs = [q_in, k, v]
    in_specs = [
        pl.BlockSpec((1, block_q, Dk), lambda b, qi: (b, qi, 0)),
        pl.BlockSpec((1, Lk, Dk), lambda b, qi: (b, 0, 0)),   # K resident per batch
        pl.BlockSpec((1, Lk, Dv), lambda b, qi: (b, 0, 0)),   # V resident per batch
    ]
    # NOTE: pl.Buffered(1) on K/V (single-buffering) would save VMEM on v7x; omitted here to keep
    # the default, known-good pipelining path. The footprint accounting above assumes 2 buffers.

    inv_temperature = 1.0 / float(temperature)
    if mask is not None:
        mask_arr = jnp.asarray(mask)
        if mask_arr.shape != (B, Lq, Lk):
            mask_arr = jnp.broadcast_to(mask_arr, (B, Lq, Lk))
        mask_i8 = mask_arr.astype(jnp.int8)
        mask_in = jnp.pad(mask_i8, ((0, 0), (0, pad_q), (0, 0))) if pad_q else mask_i8
        inputs.append(mask_in)
        in_specs.append(pl.BlockSpec((1, block_q, Lk), lambda b, qi: (b, qi, 0)))
        kernel = functools.partial(_sdpa_kernel_masked,
                                   inv_temperature=inv_temperature, mxu_dtype=mxu_dtype)
    else:
        kernel = functools.partial(_sdpa_kernel_nomask,
                                   inv_temperature=inv_temperature, mxu_dtype=mxu_dtype)

    out_shapes = (
        jax.ShapeDtypeStruct((B, Lq_pad, Dv), q.dtype),
        jax.ShapeDtypeStruct((B, Lq_pad, Lk), q.dtype),   # attn in the input dtype
    )
    out_specs = [
        pl.BlockSpec((1, block_q, Dv), lambda b, qi: (b, qi, 0)),
        pl.BlockSpec((1, block_q, Lk), lambda b, qi: (b, qi, 0)),
    ]

    vmem_limit = int(min(max(footprint(block_q) + (12 << 20), 32 << 20),
                         int(0.80 * vmem_cap)))

    out_p, attn_p = pl.pallas_call(
        kernel,
        out_shape=out_shapes,
        grid_spec=pltpu.PrefetchScalarGridSpec(
            num_scalar_prefetch=0,
            grid=(B, Lq_pad // block_q),
            in_specs=in_specs,
            out_specs=out_specs,
        ),
        compiler_params=pltpu.CompilerParams(
            dimension_semantics=("parallel", "parallel"),
            vmem_limit_bytes=vmem_limit,
        ),
    )(*inputs)

    if pad_q:
        return out_p[:, :Lq, :], attn_p[:, :Lq, :]
    return out_p, attn_p


def _reference(q, k, v, temperature, mask=None):
    attn = jnp.einsum("bqd,bkd->bqk", q, k, precision="highest") / temperature
    if mask is not None:
        attn = jnp.where(mask, -jnp.inf, attn)
    attn = jax.nn.softmax(attn, axis=2)
    out = jnp.einsum("bqk,bkd->bqd", attn, v, precision="highest")
    return out, attn


if __name__ == "__main__":
    B, Lq, Lk, Dk, Dv = 2, 8, 8, 32, 32
    temperature = float(np.sqrt(Dk))

    key = jax.random.PRNGKey(0)
    kq, kk, kv, km = jax.random.split(key, 4)
    # bf16 inputs: the kernel's MXU path is bf16 with f32 accumulation, so comparing against an
    # f32 reference built from the same bf16 values stays tight.
    q = jax.random.normal(kq, (B, Lq, Dk), dtype=jnp.float32).astype(jnp.bfloat16)
    k = jax.random.normal(kk, (B, Lk, Dk), dtype=jnp.float32).astype(jnp.bfloat16)
    v = jax.random.normal(kv, (B, Lk, Dv), dtype=jnp.float32).astype(jnp.bfloat16)
    # Deterministic mask (mask a few positions, never an entire row).
    mask = (jax.random.uniform(km, (B, Lq, Lk)) < 0.2)
    mask = mask.at[:, :, 0].set(False)

    out, attn = scaled_dot_product_attention(q, k, v, temperature, mask=mask)
    out_nm, attn_nm = scaled_dot_product_attention(q, k, v, temperature, mask=None)
    jax.block_until_ready((out, attn, out_nm, attn_nm))

    qf, kf, vf = (x.astype(jnp.float32) for x in (q, k, v))
    out_ref, attn_ref = _reference(qf, kf, vf, temperature, mask=mask)
    out_ref_nm, attn_ref_nm = _reference(qf, kf, vf, temperature, mask=None)

    # Tolerance covers bf16 attn/output storage, the bf16-scaled q, and the EUP approx reciprocal.
    tol = dict(rtol=2e-2, atol=2e-2)
    np.testing.assert_allclose(np.asarray(out, np.float32), np.asarray(out_ref), **tol)
    np.testing.assert_allclose(np.asarray(attn, np.float32), np.asarray(attn_ref), **tol)
    np.testing.assert_allclose(np.asarray(out_nm, np.float32), np.asarray(out_ref_nm), **tol)
    np.testing.assert_allclose(np.asarray(attn_nm, np.float32), np.asarray(attn_ref_nm), **tol)

    print("KERNEL_OK")
</pallas_src>

<mosaic_0001>
module attributes {stable_mosaic.version = 11 : i64} {
  func.func @_sdpa_kernel_masked(%arg0: i32, %arg1: i32, %arg2: memref<1x32x32xbf16, #tpu.memory_space<vmem>>, %arg3: memref<1x8x32xbf16, #tpu.memory_space<vmem>>, %arg4: memref<1x8x32xbf16, #tpu.memory_space<vmem>>, %arg5: memref<1x32x8xi8, #tpu.memory_space<vmem>>, %arg6: memref<1x32x32xbf16, #tpu.memory_space<vmem>>, %arg7: memref<1x32x8xbf16, #tpu.memory_space<vmem>>) attributes {dimension_semantics = [#tpu.dimension_semantics<parallel>, #tpu.dimension_semantics<parallel>], iteration_bounds = array<i64: 2, 1>, scalar_prefetch = 0 : i64, scratch_operands = 0 : i64, tpu.core_type = #tpu.core_type<tc>, window_params = [{transform_indices = @transform_0, window_bounds = array<i64: 1, 32, 32>}, {transform_indices = @transform_1, window_bounds = array<i64: 1, 8, 32>}, {transform_indices = @transform_2, window_bounds = array<i64: 1, 8, 32>}, {transform_indices = @transform_3, window_bounds = array<i64: 1, 32, 8>}, {transform_indices = @transform_4, window_bounds = array<i64: 1, 32, 32>}, {transform_indices = @transform_5, window_bounds = array<i64: 1, 32, 8>}]} {
    %c0 = arith.constant 0 : index
    %c0_0 = arith.constant 0 : index
    %c0_1 = arith.constant 0 : index
    %0 = vector.load %arg2[%c0, %c0_0, %c0_1] : memref<1x32x32xbf16, #tpu.memory_space<vmem>>, vector<1x32x32xbf16>
    %1 = vector.shape_cast %0 : vector<1x32x32xbf16> to vector<32x32xbf16>
    %c0_2 = arith.constant 0 : index
    %c0_3 = arith.constant 0 : index
    %c0_4 = arith.constant 0 : index
    %2 = vector.load %arg3[%c0_2, %c0_3, %c0_4] : memref<1x8x32xbf16, #tpu.memory_space<vmem>>, vector<1x8x32xbf16>
    %3 = vector.shape_cast %2 : vector<1x8x32xbf16> to vector<8x32xbf16>
    %c0_5 = arith.constant 0 : index
    %c0_6 = arith.constant 0 : index
    %c0_7 = arith.constant 0 : index
    %4 = vector.load %arg4[%c0_5, %c0_6, %c0_7] : memref<1x8x32xbf16, #tpu.memory_space<vmem>>, vector<1x8x32xbf16>
    %5 = vector.shape_cast %4 : vector<1x8x32xbf16> to vector<8x32xbf16>
    %c0_8 = arith.constant 0 : index
    %c0_9 = arith.constant 0 : index
    %c0_10 = arith.constant 0 : index
    %6 = vector.load %arg5[%c0_8, %c0_9, %c0_10] : memref<1x32x8xi8, #tpu.memory_space<vmem>>, vector<1x32x8xi8>
    %7 = vector.shape_cast %6 : vector<1x32x8xi8> to vector<32x8xi8>
    %cst = arith.constant 1.767580e-01 : bf16
    %8 = vector.broadcast %cst : bf16 to vector<32x32xbf16>
    %9 = arith.mulf %1, %8 : vector<32x32xbf16>
    %cst_11 = arith.constant dense<0.000000e+00> : vector<32x8xf32>
    %10 = tpu.matmul %9, %3, %cst_11 {dimension_numbers = #tpu.dot_dimension_numbers<[1], [1], [0], [0], [0, 0, 1, 0], [], []>} : vector<32x32xbf16>, vector<8x32xbf16>, vector<32x8xf32> -> vector<32x8xf32>
    %c0_i8 = arith.constant 0 : i8
    %11 = vector.broadcast %c0_i8 : i8 to vector<32x8xi8>
    %12 = arith.cmpi ne, %7, %11 : vector<32x8xi8>
    %cst_12 = arith.constant -1.000000e+30 : f32
    %13 = vector.broadcast %cst_12 : f32 to vector<32x8xf32>
    %14 = arith.select %12, %13, %10 : vector<32x8xi1>, vector<32x8xf32>
    %cst_13 = arith.constant dense<0xFF800000> : vector<32xf32>
    %15 = vector.multi_reduction <maximumf>, %14, %cst_13 [1] : vector<32x8xf32> to vector<32xf32>
    %16 = vector.shape_cast %15 : vector<32xf32> to vector<32x1xf32>
    %17 = vector.broadcast %16 : vector<32x1xf32> to vector<32x8xf32>
    %18 = arith.subf %14, %17 : vector<32x8xf32>
    %19 = math.exp %18 : vector<32x8xf32>
    %cst_14 = arith.constant dense<0.000000e+00> : vector<32xf32>
    %20 = vector.multi_reduction <add>, %19, %cst_14 [1] : vector<32x8xf32> to vector<32xf32>
    %21 = vector.shape_cast %20 : vector<32xf32> to vector<32x1xf32>
    %22 = tpu.reciprocal %21 {approx = true} : vector<32x1xf32> -> vector<32x1xf32>
    %23 = vector.broadcast %22 : vector<32x1xf32> to vector<32x8xf32>
    %24 = arith.mulf %19, %23 : vector<32x8xf32>
    %25 = arith.truncf %24 : vector<32x8xf32> to vector<32x8xbf16>
    %c0_15 = arith.constant 0 : index
    %c0_16 = arith.constant 0 : index
    %c0_17 = arith.constant 0 : index
    %26 = vector.load %arg7[%c0_15, %c0_16, %c0_17] : memref<1x32x8xbf16, #tpu.memory_space<vmem>>, vector<1x32x8xbf16>
    %27 = vector.shape_cast %26 : vector<1x32x8xbf16> to vector<32x8xbf16>
    %28 = vector.shape_cast %25 : vector<32x8xbf16> to vector<1x32x8xbf16>
    tpu.vector_store %arg7[%c0_15, %c0_16, %c0_17], %28 {strides = array<i32>} : memref<1x32x8xbf16, #tpu.memory_space<vmem>>, vector<1x32x8xbf16>,
    %29 = arith.truncf %24 : vector<32x8xf32> to vector<32x8xbf16>
    %cst_18 = arith.constant dense<0.000000e+00> : vector<32x32xf32>
    %30 = tpu.matmul %29, %5, %cst_18 {dimension_numbers = #tpu.dot_dimension_numbers<[1], [0], [0], [1], [0, 0, 1, 1], [], []>} : vector<32x8xbf16>, vector<8x32xbf16>, vector<32x32xf32> -> vector<32x32xf32>
    %31 = arith.truncf %30 : vector<32x32xf32> to vector<32x32xbf16>
    %c0_19 = arith.constant 0 : index
    %c0_20 = arith.constant 0 : index
    %c0_21 = arith.constant 0 : index
    %32 = vector.load %arg6[%c0_19, %c0_20, %c0_21] : memref<1x32x32xbf16, #tpu.memory_space<vmem>>, vector<1x32x32xbf16>
    %33 = vector.shape_cast %32 : vector<1x32x32xbf16> to vector<32x32xbf16>
    %34 = vector.shape_cast %31 : vector<32x32xbf16> to vector<1x32x32xbf16>
    tpu.vector_store %arg6[%c0_19, %c0_20, %c0_21], %34 {strides = array<i32>} : memref<1x32x32xbf16, #tpu.memory_space<vmem>>, vector<1x32x32xbf16>,
    return
  }
  func.func @transform_0(%arg0: i32, %arg1: i32) -> (i32, i32, i32) {
    %c0_i32 = arith.constant 0 : i32
    %c0_i32_0 = arith.constant 0 : i32
    return %arg0, %arg1, %c0_i32 : i32, i32, i32
  }
  func.func @transform_1(%arg0: i32, %arg1: i32) -> (i32, i32, i32) {
    %c0_i32 = arith.constant 0 : i32
    %c0_i32_0 = arith.constant 0 : i32
    %c0_i32_1 = arith.constant 0 : i32
    return %arg0, %c0_i32, %c0_i32_0 : i32, i32, i32
  }
  func.func @transform_2(%arg0: i32, %arg1: i32) -> (i32, i32, i32) {
    %c0_i32 = arith.constant 0 : i32
    %c0_i32_0 = arith.constant 0 : i32
    %c0_i32_1 = arith.constant 0 : i32
    return %arg0, %c0_i32, %c0_i32_0 : i32, i32, i32
  }
  func.func @transform_3(%arg0: i32, %arg1: i32) -> (i32, i32, i32) {
    %c0_i32 = arith.constant 0 : i32
    %c0_i32_0 = arith.constant 0 : i32
    return %arg0, %arg1, %c0_i32 : i32, i32, i32
  }
  func.func @transform_4(%arg0: i32, %arg1: i32) -> (i32, i32, i32) {
    %c0_i32 = arith.constant 0 : i32
    %c0_i32_0 = arith.constant 0 : i32
    return %arg0, %arg1, %c0_i32 : i32, i32, i32
  }
  func.func @transform_5(%arg0: i32, %arg1: i32) -> (i32, i32, i32) {
    %c0_i32 = arith.constant 0 : i32
    %c0_i32_0 = arith.constant 0 : i32
    return %arg0, %arg1, %c0_i32 : i32, i32, i32
  }
}

</mosaic_0001>

<bundles_post_ra>
// kernel: tpu_custom_call.1
= control target key start
LH: loop header
LB: loop body
LE: loop exit
PB: predicated region body
PF: predicated region fallthrough
CT: control target
= control target key end

     0   :  { %11 = vsyncpa [#allocation3], 0  ;;  %s1170_s0 = inlined_call_operand.hbm [shape: bf16[2,32,32], index: 0, kind: input, shape index: {}]   ;;  %s1171_s1 = inlined_call_operand.vmem [shape: bf16[2,8,32], index: 1, kind: input, shape index: {}]   ;;  %s1172_s2 = inlined_call_operand.vmem [shape: bf16[2,8,32], index: 2, kind: input, shape index: {}]   ;;  %s1173_s3 = inlined_call_operand.vmem [shape: s8[2,32,8], index: 3, kind: input, shape index: {}]   ;;  %s1174_s4 = inlined_call_operand.hbm [shape: bf16[2,32,32], index: 4, kind: output, shape index: {0}]   ;;  %s1175_s5 = inlined_call_operand.vmem [shape: bf16[2,32,8], index: 5, kind: output, shape index: {1}]  }
   0x1   :  { %13 = vsyncpa [#allocation3 + $0x1], 0 }
   0x2   :  { %14 = vsyncpa [#allocation4], 0 }
   0x3   :  { %16 = vsyncpa [#allocation4 + $0x1], 0  ;;  %s1002_s18 = smov 0   ;;  %s1004_s19 = smov 0  }
   0x4   :  { %s1006_s20 = smov 0   ;;  %s1008_s21 = smov 0  }
   0x5   :  { %s1010_s22 = smov 0   ;;  %s1012_s23 = smov 0  }
   0x6 LB: > { %s730_s24 = sadd.s32 4294967295, %s965_s23   ;;  %s731_s25 = sadd.s32 4294967294, %s965_s23   ;;  %s965_s23 = sphi %s1012_s23, %s22_s23   ;;  %s961_s22 = sphi %s1010_s22, %s1184_s22   ;;  %s957_s21 = sphi %s1008_s21, %s1183_s21   ;;  %s953_s20 = sphi %s1006_s20, %s1182_s20   ;;  %s949_s19 = sphi %s1004_s19, %s1181_s19   ;;  %s945_s18 = sphi %s1002_s18, %s1180_s18  }
   0x7   : > { %s34_s26 = sadd.s32 1, %s961_s22  ;;  %s43_s27 = sadd.s32 1, %s953_s20 }
   0x8   : > { %p36_p0 = scmp.ge.s32.totalorder %s34_s26, 2  ;;  %p50_p1 = scmp.ne.s32.totalorder %s953_s20, %s949_s19 }
   0x9   : > { %p51_p2 = scmp.eq.s32.totalorder %s965_s23, 0  ;;  %p56_p3 = scmp.ne.s32.totalorder %s949_s19, %s945_s18 }
   0xa   : > { %s1186_s26 = smov (%p36_p0, %s34_s26), 0  ;;  %p57_p5 = scmp.eq.s32.totalorder %s730_s24, 0 }
   0xb   : > { %p1043_p4 = por %p51_p2, %p50_p1  ;;  %s38_s29 = ssub.s32 %s961_s22, %s1186_s26 }
   0xc   : > { %p162_p6 = scmp.eq.s32.totalorder %s730_s24, 1  ;;  %p41_p7 = scmp.eq.s32.totalorder %s38_s29, 0 }
   0xd   : > { %p1049_p8 = por %p57_p5, %p56_p3  ;;  %p168_p10 = scmp.eq.s32.totalorder %s731_s25, 1 }
   0xe   : > { %p1053_p9 = por %p162_p6, %p50_p1  ;;  %p733_p12 = scmp.ge.s32.totalorder %s965_s23, 2 }
   0xf   : > { %s1058_s7 = scalar_select %p41_p7, %s953_s20, %s43_s27  }
  0x10   : > { %p1060_p11 = por %p168_p10, %p56_p3  ;;  %p782_p13 = scmp.lt.s32.totalorder %s965_s23, 2 }
  0x11   : > { %s216_s9 = sand.u32 1, %s953_s20   ;;  %s755_s11 = sshll.u32 %s961_s22, 4 }
  0x12   : > { %s734_s10 = sshll.u32 %s216_s9, 4  ;;  %s227_s14 = scalar_lea.hbm %s1170_s0, %s755_s11 }
  0x13   : > { %s220_s15 = scalar_lea.vmem [#allocation2], %s734_s10  ;;  %s228_s17 = sshll.u32 %s227_s14, 4  ;;  %s229_s17 = int_to_ptr.hbm [resolvable:$true] %s228_s17 }
  0x14   : > { %s230_s16 = sshll.u32 %s220_s15, 4  ;;  %p775_p0 = pnand %p782_p13, %p1043_p4  ;;  %s231_s16 = int_to_ptr.vmem [resolvable:$true] %s230_s16 }
  0x15   : > { %p737_p1 = scmp.ge.s32.totalorder %s965_s23, 1  ;;  %s217_s24 = scalar_lea.sflag [#allocation3], %s216_s9 }
  0x16   : > { %s967_s25 = smov 64   ;;  %s968_s27 = smov 4  }
  0x17   : > { %777 = dma.hbm_to_vmem [thread:$0]  (!%p775_p0), %s229_s17, 256, %s231_s16, %s217_s24, %s967_s25, %s967_s25, %s968_s27  }
  0x18   : > { %p265_p2 = scmp.lt.s32.totalorder %s965_s23, 3 }
  0x1a   : > { %p266_p3 = pnand %p737_p1, %p265_p2 }
  0x1b   : > { %s1076_s29 = sand.u32 (!%p266_p3), 1, %s949_s19  }
  0x1c   : > { %269 = sbr.rel (%p266_p3) target bundleno = 596 (0x254), region = 36  ;;  %s738_s10 = sshll.u32 (!%p266_p3), %s1076_s29, 4 }
  0x1d   : > { %s272_s11 = scalar_lea.sflag (!%p266_p3), [#allocation3], %s1076_s29  ;;  %s275_s28 = scalar_lea.vmem (!%p266_p3), [#allocation2], %s738_s10 }
  0x21   : > { %936 = dma.done.wait (%p1049_p8), %s272_s11, 256  }
  0x22   : > { %938 = vsyncadd (%p1049_p8), %s272_s11, 4294967040  ;;  %p330_p4 = scmp.lt.s32.totalorder %s957_s21, 1  ;;  %vm382_vm0 = vcmask 261120   ;;  %v760_v1 = vld [vmem:[%s275_s28] sm:$0xff]   ;;  %v767_v2 = vld [vmem:[%s275_s28 + $0x8] sm:$0xff]   ;;  %v969_v15 = vmov 0  }
  0x23   : > { %v761_v4 = vunpack.c.l.bf16 %v760_v1  ;;  %v762_v5 = vunpack.c.h.bf16 %v760_v1  ;;  %v765_v6 = vunpack.c.l.bf16 %v767_v2  ;;  %v766_v7 = vunpack.c.h.bf16 %v767_v2  ;;  %s903_s13 = scalar_lea.hbm %s1174_s4, 32 }
  0x24   : > { %s1088_s9 = scalar_select %p330_p4, %s957_s21, 1  ;;  %vm431_vm5 = vcmask 64512   ;;  %vm501_vm10 = vcmask 1043456   ;;  %vm480_vm11 = vcmask 60416   ;;  %vm528_vm12 = vcmask 257024  }
  0x25   : > { %v376_v8 = vmul.f32 0.17675781, %v761_v4  ;;  %v377_v9 = vmul.f32 0.17675781, %v762_v5  ;;  %v378_v10 = vmul.f32 0.17675781, %v765_v6  ;;  %v379_v11 = vmul.f32 0.17675781, %v766_v7 }
  0x26   : > { %s740_s12 = sshll.u32 %s1088_s9, 2  ;;  %s756_s30 = sshll.u32 %s1088_s9, 3 }
  0x27   : > { %s333_s15 = scalar_lea.vmem %s1171_s1, %s740_s12  ;;  %v380_v12 = vpack.c.bf16 %v377_v9, %v376_v8  ;;  %v381_v13 = vpack.c.bf16 %v379_v11, %v378_v10  ;;  %s346_s24 = scalar_lea.vmem %s1173_s3, %s756_s30 }
  0x28   : > { %v366_v0 = vld [vmem:[%s333_s15] sm:$0xf]  ;;  %v370_v17 = vld [vmem:[%s346_s24 + $0x4] sm:$0x3]  ;;  %v371_v22 = vld [vmem:[%s346_s24 + $0x6] sm:$0x3]  ;;  %s337_s11 = scalar_lea.vmem %s1172_s2, %s740_s12 }
  0x29   : > { %v390_v3 = vsel %vm382_vm0, %v366_v0, 0  ;;  %v368_v14 = vld [vmem:[%s346_s24] sm:$0x3]  ;;  %v369_v18 = vld [vmem:[%s346_s24 + $0x2] sm:$0x3]  ;;  %vm413_vm2 = vnez %v370_v17  ;;  %vm414_vm6 = vnez %v371_v22  ;;  %s757_s28 = sshll.u32 %s1088_s9, 4 }
  0x2a   : > { %399 = vmatpush.bf16.xpose.msra.mxu0 %v390_v3  ;;  %768 = vmatpush.bf16.xpose.msra.mxu2 %v390_v3  ;;  %vm411_vm1 = vnez %v368_v14  ;;  %vm412_vm3 = vnez %v369_v18  ;;  %v417_v20 = vsel %vm413_vm2, 16843009, %v969_v15  ;;  %v418_v28 = vsel %vm414_vm6, 16843009, %v969_v15  ;;  %v367_v59 = vld [vmem:[%s337_s11] sm:$0xf]  ;;  %s357_s15 = scalar_lea.vmem %s1175_s5, %s757_s28 }
  0x2b   : > { %v415_v16 = vsel %vm411_vm1, 16843009, %v969_v15  ;;  %v416_v21 = vsel %vm412_vm3, 16843009, %v969_v15  ;;  %v421_v24 = vunpack.c.0.s8 %v417_v20  ;;  %v422_v33 = vunpack.c.0.s8 %v418_v28  ;;  %s317_s9 = scalar_lea.vmem [#allocation5], %s738_s10  ;;  %s758_s12 = sshll.u32 %s957_s21, 4 }
  0x2c   : > { %v419_v19 = vunpack.c.0.s8 %v415_v16  ;;  %v420_v27 = vunpack.c.0.s8 %v416_v21  ;;  %v503_v60 = vsel %vm501_vm10, %v367_v59, 0  ;;  %s556_s17 = scalar_lea.hbm %s1174_s4, %s758_s12  ;;  %s557_s24 = sshll.u32 %s317_s9, 4  ;;  %s558_s24 = int_to_ptr.vmem [resolvable:$true] %s557_s24 }
  0x2d   : > { %vm425_vm7 = vcmp.ne.s32.totalorder %v421_v24, 0  ;;  %vm426_vm9 = vcmp.ne.s32.totalorder %v422_v33, 0  ;;  %512 = vmatpush.bf16.msra.mxu1 %v503_v60  ;;  %769 = vmatpush.bf16.msra.mxu3 %v503_v60  ;;  %s559_s25 = sshll.u32 %s556_s17, 4  ;;  %s534_s10 = scalar_lea.sflag [#allocation4], %s1076_s29  ;;  %s560_s25 = int_to_ptr.hbm [resolvable:$true] %s559_s25 }
  0x2e   : > { %vm423_vm4 = vcmp.ne.s32.totalorder %v419_v19, 0  ;;  %vm424_vm8 = vcmp.ne.s32.totalorder %v420_v27, 0  ;;  %s897_s27 = sshra.s32 %s560_s25, 4  ;;  %s898_s27 = int_to_ptr.hbm [resolvable:$true] %s897_s27 }
  0x2f   : > { %s899_s21 = scalar_lea.hbm %s898_s27, 16  ;;  %p904_p8 = scmp.lt.s32.totalorder %s898_s27, %s1174_s4 }
  0x30   : > { %p900_p5 = scmp.ne.s32.totalorder %s898_s27, %s899_s21  ;;  %p905_p10 = scmp.lt.s32.totalorder %s903_s13, %s899_s21 }
  0x31   : > { %746 = vmatmul.msk.bf16.vlgmr.msra.gmra.mxu0 %vm382_vm0, %v380_v12  ;;  %747 = vmatmul.msk.bf16.vlgmr.msra.gmra.mxu2 %vm382_vm0, %v381_v13 }
  0x32   : > { %p901_p6 = pnand %p900_p5, %p1053_p9  ;;  %p906_p13 = por %p905_p10, %p904_p8 }
  0x34   : > { %p902_p7 = pneg %p901_p6 }
  0x36   : > { %p907_p0 = pnand %p906_p13, %p902_p7 }
  0xae   : > { %v401_v23 = vpop.f32.mrf.mxu0 }
  0xaf   : > { %v427_v25 = vsel %vm423_vm4, -1e+30, %v401_v23 }
  0xb0   : > { %v432_v26 = vsel %vm431_vm5, %v427_v25, -inf }
  0xb1   : > { %433 = vmax.xlane.f32.xlu1 %v432_v26 }
  0xb4   : > { %v406_v29 = vpop.f32.mrf.mxu2 }
  0xb5   : > { %v429_v30 = vsel %vm425_vm7, -1e+30, %v406_v29 }
  0xb6   : > { %v403_v31 = vpop.f32.mrf.mxu0  ;;  %v438_v32 = vsel %vm431_vm5, %v429_v30, -inf }
  0xb7   : > { %v428_v34 = vsel %vm424_vm8, -1e+30, %v403_v31  ;;  %439 = vmax.xlane.f32.xlu0 %v438_v32 }
  0xb8   : > { %v435_v35 = vsel %vm431_vm5, %v428_v34, -inf }
  0xb9   : > { %436 = vmax.xlane.f32.xlu1 %v435_v35 }
  0xbc   : > { %v408_v36 = vpop.f32.mrf.mxu2 }
  0xbd   : > { %v430_v37 = vsel %vm426_vm9, -1e+30, %v408_v36 }
  0xbe   : > { %v441_v38 = vsel %vm431_vm5, %v430_v37, -inf }
  0xbf   : > { %442 = vmax.xlane.f32.xlu0 %v441_v38 }
 0x124   : > { %v434_v39 = vpop.xlane.xlu1 %433 }
 0x125   : > { %v444_v40 = vsub.f32 %v427_v25, %v434_v39 }
 0x127   : > { %v448_v41 = vmul.f32 1.442695, %v444_v40 }
 0x129   : > { %837 = vpow2.f32 %v448_v41 }
 0x12a   : > { %v440_v42 = vpop.xlane.xlu0 %439 }
 0x12b   : > { %v446_v43 = vsub.f32 %v429_v30, %v440_v42 }
 0x12c   : > { %v437_v44 = vpop.xlane.xlu1 %436 }
 0x12d   : > { %v452_v45 = vmul.f32 1.442695, %v446_v43  ;;  %v445_v46 = vsub.f32 %v428_v34, %v437_v44 }
 0x12f   : > { %v838_v47 = vpop.eup %837  ;;  %839 = vpow2.f32 %v452_v45  ;;  %v450_v48 = vmul.f32 1.442695, %v445_v46 }
 0x130   : > { %v456_v49 = vsel %vm431_vm5, %v838_v47, 0.0 }
 0x131   : > { %841 = vpow2.f32 %v450_v48  ;;  %457 = vadd.xlane.f32.xlu0 %v456_v49 }
 0x132   : > { %v443_v50 = vpop.xlane.xlu0 %442 }
 0x133   : > { %v447_v51 = vsub.f32 %v430_v37, %v443_v50 }
 0x135   : > { %v840_v52 = vpop.eup %839  ;;  %v454_v53 = vmul.f32 1.442695, %v447_v51 }
 0x136   : > { %v462_v54 = vsel %vm431_vm5, %v840_v52, 0.0 }
 0x137   : > { %v842_v55 = vpop.eup %841  ;;  %843 = vpow2.f32 %v454_v53  ;;  %463 = vadd.xlane.f32.xlu2 %v462_v54 }
 0x138   : > { %v459_v56 = vsel %vm431_vm5, %v842_v55, 0.0 }
 0x139   : > { %460 = vadd.xlane.f32.xlu1 %v459_v56 }
 0x13d   : > { %v844_v57 = vpop.eup %843 }
 0x13e   : > { %v465_v58 = vsel %vm431_vm5, %v844_v57, 0.0 }
 0x13f   : > { %466 = vadd.xlane.f32.xlu2 %v465_v58 }
 0x1a4   : > { %v458_v61 = vpop.xlane.xlu0 %457 }
 0x1a5   : > { %845 = vrcp.f32 %v458_v61 }
 0x1aa   : > { %v464_v62 = vpop.xlane.xlu2 %463 }
 0x1ab   : > { %v846_v63 = vpop.eup %845  ;;  %847 = vrcp.f32 %v464_v62 }
 0x1ac   : > { %v472_v0 = vmul.f32 %v846_v63, %v838_v47  ;;  %v461_v1 = vpop.xlane.xlu1 %460 }
 0x1ad   : > { %849 = vrcp.f32 %v461_v1 }
 0x1ae   : > { %v476_v2 = vpack.c.bf16 %v472_v0, %v472_v0 }
 0x1b0   : > { %481 = vst.msk [vmem:[%s357_s15] sm:$0xf] %vm480_vm11, %v476_v2  ;;  %v489_v10 = vunpack.c.l.b16 %v476_v2 }
 0x1b1   : > { %v848_v3 = vpop.eup %847 }
 0x1b2   : > { %v474_v4 = vmul.f32 %v848_v3, %v840_v52  ;;  %v467_v5 = vpop.xlane.xlu2 %466 }
 0x1b3   : > { %v850_v6 = vpop.eup %849  ;;  %851 = vrcp.f32 %v467_v5 }
 0x1b4   : > { %v473_v7 = vmul.f32 %v850_v6, %v842_v55  ;;  %v478_v8 = vpack.c.bf16 %v474_v4, %v474_v4 }
 0x1b6   : > { %v477_v9 = vpack.c.bf16 %v473_v7, %v473_v7  ;;  %483 = vst.msk [vmem:[%s357_s15 + $0x8] sm:$0xf] %vm480_vm11, %v478_v8  ;;  %v491_v16 = vunpack.c.l.b16 %v478_v8 }
 0x1b8   : > { %482 = vst.msk [vmem:[%s357_s15 + $0x4] sm:$0xf] %vm480_vm11, %v477_v9  ;;  %v490_v11 = vunpack.c.l.b16 %v477_v9 }
 0x1b9   : > { %v852_v12 = vpop.eup %851 }
 0x1ba   : > { %v475_v13 = vmul.f32 %v852_v12, %v844_v57  ;;  %v493_v14 = vpack.c.b16 %v490_v11, %v489_v10 }
 0x1bc   : > { %v479_v15 = vpack.c.bf16 %v475_v13, %v475_v13  ;;  %748 = vmatmul.msk.bf16.vlgmr.msra.gmra.mxu1 %vm431_vm5, %v493_v14 }
 0x1be   : > { %484 = vst.msk [vmem:[%s357_s15 + $0xc] sm:$0xf] %vm480_vm11, %v479_v15  ;;  %v492_v17 = vunpack.c.l.b16 %v479_v15 }
 0x1c0   : > { %v494_v18 = vpack.c.b16 %v492_v17, %v491_v16 }
 0x1c2   : > { %749 = vmatmul.msk.bf16.vlgmr.msra.gmra.mxu3 %vm431_vm5, %v494_v18 }
 0x239   : > { %v514_v19 = vpop.f32.mrf.mxu1 }
 0x23a   : > { %v524_v20 = vpack.c.bf16 %v514_v19, %v514_v19 }
 0x23c   : > { %529 = vst.msk [vmem:[%s317_s9] sm:$0xf] %vm528_vm12, %v524_v20 }
 0x241   : > { %v516_v21 = vpop.f32.mrf.mxu1 }
 0x242   : > { %v525_v22 = vpack.c.bf16 %v516_v21, %v516_v21 }
 0x244   : > { %530 = vst.msk [vmem:[%s317_s9 + $0x4] sm:$0xf] %vm528_vm12, %v525_v22 }
 0x245   : > { %v519_v23 = vpop.f32.mrf.mxu3 }
 0x246   : > { %v526_v24 = vpack.c.bf16 %v519_v23, %v519_v23 }
 0x248   : > { %531 = vst.msk [vmem:[%s317_s9 + $0x8] sm:$0xf] %vm528_vm12, %v526_v24 }
 0x24d   : > { %v521_v25 = vpop.f32.mrf.mxu3 }
 0x24e   : > { %v527_v26 = vpack.c.bf16 %v521_v25, %v521_v25 }
 0x250   : > { %532 = vst.msk [vmem:[%s317_s9 + $0xc] sm:$0xf] %vm528_vm12, %v527_v26 }
 0x251   : > { %910 = shalt.err (!%p907_p0)
}
 0x252   : > { %s970_s29 = smov 64   ;;  %s971_s9 = smov 4  }
 0x253   : > { %772 = dma.vmem_to_hbm [thread:$0]  (%p1053_p9), %s558_s24, 256, %s560_s25, %s534_s10, %s970_s29, %s970_s29, %s971_s9  }
 0x254 PF: > { %s578_s12 = sand.u32 1, %s945_s18   ;;  %p779_p1 = pnand %p733_p12, %p1060_p11 }
 0x255   : > { %s579_s30 = scalar_lea.sflag [#allocation4], %s578_s12 }
 0x256   : > { %p780_p2 = pneg %p779_p1 }
 0x258   : > { %940 = dma.done.wait (%p780_p2), %s579_s30, 256  }
 0x259   : > { %942 = vsyncadd (%p780_p2), %s579_s30, 4294967040  ;;  %s22_s23 = sadd.s32 1, %s965_s23   ;;  %s1180_s18 = smov %s949_s19 }
 0x25a   : > { %p19_p3 = scmp.ge.s32.totalorder %s22_s23, 4   ;;  %s1181_s19 = smov %s953_s20 }
 0x25b   : > { %s1182_s20 = smov %s1058_s7  ;;  %s1183_s21 = smov %s961_s22 }
 0x25c   : > { %s1184_s22 = smov %s1186_s26  ;;  %21 = sbr.rel (!%p19_p3) target bundleno = 6 (0x6), region = 102 }
 0x261   :  { %597 = vsyncpa [#allocation3], 1 }
 0x262   :  { %599 = vsyncpa [#allocation3 + $0x1], 1 }
 0x263   :  { %600 = vsyncpa [#allocation4], 1 }
 0x264   :  { %602 = vsyncpa [#allocation4 + $0x1], 1 }

</bundles_post_ra>
